<compile_context>
chip_gen: v6e
topology: v6e:2x2x1
jax: 0.10.0
libtpu: 0.0.40
codegen_flags: <defaults>
</compile_context>

<pallas_src>
import jax
import jax.numpy as jnp
from jax.experimental import pallas as pl
from jax.experimental.pallas import tpu as pltpu

_NEG_SLOPE = 0.2
_MIN_LANE = 128
# Candidate lane widths, widest first (wide lane-dense output -> unmasked vst,
# contiguous DMA descriptors).
_LANE_WIDTHS = (2048, 1024, 512, 256, 128)
# Per-operand block byte budget. Tile sweeps flatten past ~1-4 MiB; 2 MiB keeps
# (input + output) x 2 pipeline buffers = 8 MiB, under every chip's default
# scoped VMEM limit (incl. v5e's 16 MiB and v7x's 32 MiB).
_TARGET_TILE_BYTES = 2 * 1024 * 1024


def _leaky_relu_kernel(x_ref, o_ref):
    x = x_ref[...]
    # One compare + one mul + one select per vreg, constant kept in the native
    # dtype (no extra casts; friendly to v5e's no-bf16 VPU as well).
    o_ref[...] = jnp.where(x >= 0, x, x * jnp.asarray(_NEG_SLOPE, x.dtype))


def _sublane_multiple(dtype) -> int:
    # Native packed-tile sublane multiple: 8 for 4-byte, 16 for 2-byte, 32 for 1-byte.
    return {4: 8, 2: 16, 1: 32}.get(jnp.dtype(dtype).itemsize, 8)


def leaky_relu2(x: jax.Array) -> jax.Array:
    """Elementwise LeakyReLU(0.2), matching nn.LeakyReLU(0.2) forward semantics."""
    orig_shape = x.shape
    dtype = x.dtype
    itemsize = jnp.dtype(dtype).itemsize
    sub = _sublane_multiple(dtype)
    total = x.size

    if total == 0:
        return x

    # Pick the widest lane dimension that requires no padding; only fall back
    # to 128 lanes + minimal tail padding if nothing fits (avoids extra HBM
    # passes from concat/slice on the common aligned path).
    lanes = None
    for w in _LANE_WIDTHS:
        if total % w == 0:
            lanes = w
            break

    padded_total = total
    if lanes is None:
        lanes = _MIN_LANE
        padded_total = pl.cdiv(total, lanes) * lanes

    if padded_total == total:
        x2d = x.reshape(padded_total // lanes, lanes)  # row-major reshape: free
    else:
        flat = x.reshape(-1)
        flat = jnp.concatenate(
            [flat, jnp.zeros((padded_total - total,), dtype=dtype)]
        )
        x2d = flat.reshape(padded_total // lanes, lanes)

    rows = padded_total // lanes

    # Big sublane blocks (multiple of the native packed-tile sublane count).
    # If the whole slab fits in one block we use the full row extent (block
    # shape == array shape is always legal, even if rows % sub != 0); otherwise
    # Pallas masks the partial trailing block automatically.
    max_block_rows = max(sub, (_TARGET_TILE_BYTES // (lanes * itemsize)) // sub * sub)
    block_rows = min(rows, max_block_rows)

    grid = (pl.cdiv(rows, block_rows),)

    out2d = pl.pallas_call(
        _leaky_relu_kernel,
        out_shape=jax.ShapeDtypeStruct((rows, lanes), dtype),
        grid_spec=pltpu.PrefetchScalarGridSpec(
            num_scalar_prefetch=0,
            grid=grid,
            in_specs=[pl.BlockSpec((block_rows, lanes), lambda i: (i, 0))],
            out_specs=pl.BlockSpec((block_rows, lanes), lambda i: (i, 0)),
        ),
        compiler_params=pltpu.CompilerParams(
            # TODO(synk): on v7x, switch this axis to pltpu.CORE_PARALLEL (or use
            # pl.core_map) so row blocks are sharded across both TensorCores.
            dimension_semantics=("parallel",),
        ),
        cost_estimate=pl.CostEstimate(
            flops=2 * total, transcendentals=0, bytes_accessed=2 * total * itemsize
        ),
    )(x2d)

    if padded_total == total:
        return out2d.reshape(orig_shape)
    return out2d.reshape(-1)[:total].reshape(orig_shape)


if __name__ == "__main__":
    key = jax.random.PRNGKey(0)
    # NCHW input, as PyTorch would feed a conv-style tensor.
    x = jax.random.normal(key, (2, 4, 16, 16), dtype=jnp.float32)

    out = leaky_relu2(x)
    jax.block_until_ready(out)

    # Reference check against plain JAX leaky relu.
    ref = jnp.where(x >= 0, x, 0.2 * x)
    assert out.shape == x.shape
    assert out.dtype == x.dtype
    assert jnp.allclose(out, ref, atol=1e-6), "mismatch vs reference"

    print("KERNEL_OK")
</pallas_src>

<mosaic_0001>
module attributes {stable_mosaic.version = 11 : i64} {
  func.func @_leaky_relu_kernel(%arg0: i32, %arg1: memref<1x2048xf32, #tpu.memory_space<vmem>>, %arg2: memref<1x2048xf32, #tpu.memory_space<vmem>>) attributes {dimension_semantics = [#tpu.dimension_semantics<parallel>], iteration_bounds = array<i64: 1>, scalar_prefetch = 0 : i64, scratch_operands = 0 : i64, tpu.core_type = #tpu.core_type<tc>, window_params = [{transform_indices = @transform_0, window_bounds = array<i64: 1, 2048>}, {transform_indices = @transform_1, window_bounds = array<i64: 1, 2048>}]} {
    %c0 = arith.constant 0 : index
    %c0_0 = arith.constant 0 : index
    %0 = vector.load %arg1[%c0, %c0_0] : memref<1x2048xf32, #tpu.memory_space<vmem>>, vector<1x2048xf32>
    %cst = arith.constant 0.000000e+00 : f32
    %1 = vector.broadcast %cst : f32 to vector<1x2048xf32>
    %2 = arith.cmpf oge, %0, %1 : vector<1x2048xf32>
    %cst_1 = arith.constant 2.000000e-01 : f32
    %3 = vector.broadcast %cst_1 : f32 to vector<1x2048xf32>
    %4 = arith.mulf %0, %3 : vector<1x2048xf32>
    %5 = arith.select %2, %0, %4 : vector<1x2048xi1>, vector<1x2048xf32>
    %c0_2 = arith.constant 0 : index
    %c0_3 = arith.constant 0 : index
    %6 = vector.load %arg2[%c0_2, %c0_3] : memref<1x2048xf32, #tpu.memory_space<vmem>>, vector<1x2048xf32>
    tpu.vector_store %arg2[%c0_2, %c0_3], %5 {strides = array<i32>} : memref<1x2048xf32, #tpu.memory_space<vmem>>, vector<1x2048xf32>,
    return
  }
  func.func @transform_0(%arg0: i32) -> (i32, i32) {
    %c0_i32 = arith.constant 0 : i32
    %c0_i32_0 = arith.constant 0 : i32
    return %arg0, %c0_i32 : i32, i32
  }
  func.func @transform_1(%arg0: i32) -> (i32, i32) {
    %c0_i32 = arith.constant 0 : i32
    %c0_i32_0 = arith.constant 0 : i32
    return %arg0, %c0_i32 : i32, i32
  }
}

</mosaic_0001>

<bundles_post_ra>
// kernel: tpu_custom_call.1
= control target key start
LH: loop header
LB: loop body
LE: loop exit
PB: predicated region body
PF: predicated region fallthrough
CT: control target
= control target key end

     0   :  { %6 = vsyncpa [#allocation3], 0  ;;  %s110_s0 = inlined_call_operand.hbm [shape: f32[1,2048], index: 0, kind: input, shape index: {}]   ;;  %s111_s1 = inlined_call_operand.hbm [shape: f32[1,2048], index: 1, kind: output, shape index: {}]  }
   0x1   :  { %7 = vsyncpa [#allocation4], 0  ;;  %s92_s6 = smov [#allocation2]  }
   0x2   :  { %s14_s7 = sshll.u32 %s92_s6, 4  ;;  %s15_s7 = int_to_ptr.vmem [resolvable:$true] %s14_s7 }
   0x3   :  { %s56_s8 = scalar_lea.vmem %s15_s7, 256  ;;  %p61_p1 = scmp.lt.s32.totalorder %s15_s7, %s15_s7 }
   0x4   :  { %p57_p0 = scmp.ne.s32.totalorder %s15_s7, %s56_s8  ;;  %p62_p2 = scmp.lt.s32.totalorder %s56_s8, %s56_s8 }
   0x6   :  { %p63_p3 = por %p62_p2, %p61_p1 }
   0x8   :  { %p64_p4 = pnand %p63_p3, %p57_p0 }
   0xa   :  { %67 = shalt.err (!%p64_p4)
}
   0xb   :  { %17 = dma.hbm_to_vmem [thread:$0]  %s110_s0, 256, %s15_s7, [#allocation3]  }
   0xc   :  { %88 = dma.done.wait [#allocation3], 256  }
   0xd   :  { %89 = vsyncadd [#allocation3], 4294967040  ;;  %s93_s11 = smov [#allocation5]   ;;  %v21_v0 = vld [vmem:[#allocation2] sm:$0xff]  ;;  %v22_v1 = vld [vmem:[#allocation2 + $0x8] sm:$0xff] }
   0xe   :  { %s37_s12 = sshll.u32 %s93_s11, 4  ;;  %vm23_vm0 = vcmp.ge.f32.partialorder %v21_v0, 0.0  ;;  %v25_v2 = vmul.f32 0.2, %v21_v0  ;;  %vm24_vm1 = vcmp.ge.f32.partialorder %v22_v1, 0.0  ;;  %s38_s12 = int_to_ptr.vmem [resolvable:$true] %s37_s12 }
   0xf   :  { %v26_v3 = vmul.f32 0.2, %v22_v1  ;;  %s68_s13 = scalar_lea.vmem %s38_s12, 256  ;;  %p73_p6 = scmp.lt.s32.totalorder %s38_s12, %s38_s12 }
  0x10   :  { %v27_v4 = vsel %vm23_vm0, %v21_v0, %v25_v2  ;;  %p69_p5 = scmp.ne.s32.totalorder %s38_s12, %s68_s13  ;;  %p74_p7 = scmp.lt.s32.totalorder %s68_s13, %s68_s13 }
  0x11   :  { %v28_v5 = vsel %vm24_vm1, %v22_v1, %v26_v3  ;;  %29 = vst [vmem:[#allocation5] sm:$0xff] %v27_v4 }
  0x12   :  { %30 = vst [vmem:[#allocation5 + $0x8] sm:$0xff] %v28_v5  ;;  %p75_p8 = por %p74_p7, %p73_p6 }
  0x14   :  { %p76_p9 = pnand %p75_p8, %p69_p5 }
  0x16   :  { %79 = shalt.err (!%p76_p9)
}
  0x17   :  { %40 = dma.vmem_to_hbm [thread:$0]  %s38_s12, 256, %s111_s1, [#allocation4]  }
  0x18   :  { %90 = dma.done.wait [#allocation4], 256  }
  0x19   :  { %91 = vsyncadd [#allocation4], 4294967040 }
  0x1a   :  { %44 = vsyncpa [#allocation3], 1 }
  0x1b   :  { %45 = vsyncpa [#allocation4], 1 }

</bundles_post_ra>
